<compile_context>
chip_gen: v7x
topology: tpu7x:2x2x1
jax: 0.10.0
libtpu: 0.0.40
codegen_flags: <defaults>
</compile_context>

<pallas_src>
import jax
import jax.numpy as jnp
from jax.experimental import pallas as pl
from jax.experimental.pallas import tpu as pltpu


# -----------------------------------------------------------------------------
# One-time weight packing (call at model init, NOT per step).
# nn.Linear stores W as [out, in]; we transpose to [in, out] so kernels compute
# y = x @ W directly.  Gate weights are packed column-wise as [r | p | z].
# -----------------------------------------------------------------------------
def prepare_params(params, compute_dtype=jnp.float32):
    cast = lambda w: w.astype(compute_dtype)
    wx_g = jnp.concatenate(
        [params["WA_xr"].T, params["WA_xp"].T, params["WA_xz"].T], axis=1)  # [H, 3D]
    wx_h = params["WA_xh"].T                                                # [H, D]
    ws_g = jnp.concatenate(
        [params["WA_hr"].T, params["WA_hp"].T, params["WA_hz"].T], axis=1)  # [D, 3D]
    va_g = jnp.concatenate(
        [params["VA_hr"].T, params["VA_hp"].T, params["VA_hz"].T], axis=1)  # [D, 3D]
    return {
        "wx_g": cast(wx_g), "wx_h": cast(wx_h),
        "ws_g": cast(ws_g), "va_g": cast(va_g),
        "whh": cast(params["WA_hh"].T), "vhh": cast(params["VA_hh"].T),
    }


# -----------------------------------------------------------------------------
# Single-step kernel (module forward, one call).
# -----------------------------------------------------------------------------
def update_speaker_kernel(x_ref, s_ref, a_ref,
                          wxg_ref, wxh_ref, ws_ref, va_ref, whh_ref, vhh_ref,
                          out_ref):
    D = out_ref.shape[-1]
    wdt = wxg_ref.dtype

    x = x_ref[...]
    s = s_ref[...].astype(jnp.float32)
    a = a_ref[...].astype(jnp.float32)

    # Three accumulated dots into one f32 accumulator (no lane-dim concat).
    gates_pre = (
        jnp.dot(x.astype(wdt), wxg_ref[...], preferred_element_type=jnp.float32)
        + jnp.dot(s.astype(wdt), ws_ref[...], preferred_element_type=jnp.float32)
        + jnp.dot(a.astype(wdt), va_ref[...], preferred_element_type=jnp.float32)
    )
    gates = jax.nn.sigmoid(gates_pre)              # one EUP pass over [B, 3D]
    r_t = gates[:, 0 * D:1 * D]
    p_t = gates[:, 1 * D:2 * D]
    z_t = gates[:, 2 * D:3 * D]

    h_tilde = jnp.tanh(
        jnp.dot(x.astype(wdt), wxh_ref[...], preferred_element_type=jnp.float32)
        + jnp.dot((r_t * s).astype(wdt), whh_ref[...], preferred_element_type=jnp.float32)
        + jnp.dot((p_t * a).astype(wdt), vhh_ref[...], preferred_element_type=jnp.float32)
    )

    new_s = (1.0 - z_t) * s + z_t * h_tilde
    out_ref[...] = new_s.astype(out_ref.dtype)


def update_speaker(encoder_hidden, spk_vectors, adr_vectors, packed):
    """Single fused step; expects pre-packed weights from prepare_params()."""
    B, H = encoder_hidden.shape
    D = spk_vectors.shape[1]

    full = lambda shape: pl.BlockSpec(shape, lambda: tuple(0 for _ in shape))

    return pl.pallas_call(
        update_speaker_kernel,
        out_shape=jax.ShapeDtypeStruct((B, D), spk_vectors.dtype),
        grid=(),
        in_specs=[
            full((B, H)),          # encoder_hidden
            full((B, D)),          # spk_vectors
            full((B, D)),          # adr_vectors
            full((H, 3 * D)),      # wx_g
            full((H, D)),          # wx_h
            full((D, 3 * D)),      # ws_g
            full((D, 3 * D)),      # va_g
            full((D, D)),          # whh
            full((D, D)),          # vhh
        ],
        out_specs=full((B, D)),
    )(encoder_hidden, spk_vectors, adr_vectors,
      packed["wx_g"], packed["wx_h"], packed["ws_g"], packed["va_g"],
      packed["whh"], packed["vhh"])


# -----------------------------------------------------------------------------
# Sequence kernel: T recurrent steps in ONE pallas_call.
# Weights + the full x sequence use constant index_maps (DMA'd once, stay
# VMEM-resident); the recurrent state lives in VMEM scratch; adr_vectors are
# streamed per step.  The non-recurrent x-projection for all T steps is
# computed once at t==0 as a single big-M matmul.
# -----------------------------------------------------------------------------
def update_speaker_seq_kernel(x_ref, a_ref, s0_ref,
                              wxg_ref, wxh_ref, ws_ref, va_ref, whh_ref, vhh_ref,
                              out_ref,
                              s_state, gx_gates, gx_cand):
    t = pl.program_id(0)
    T, B, H = x_ref.shape
    D = out_ref.shape[-1]
    wdt = wxg_ref.dtype

    @pl.when(t == 0)
    def _init():
        s_state[...] = s0_ref[...].astype(jnp.float32)
        # Hoisted x-projection: fill the MXU M dimension with T*B rows.
        x_all = x_ref[...].reshape(T * B, H).astype(wdt)
        gx_gates[...] = jnp.dot(
            x_all, wxg_ref[...], preferred_element_type=jnp.float32
        ).reshape(T, B, 3 * D)
        gx_cand[...] = jnp.dot(
            x_all, wxh_ref[...], preferred_element_type=jnp.float32
        ).reshape(T, B, D)

    s = s_state[...]
    a = a_ref[0].astype(jnp.float32)

    gates = jax.nn.sigmoid(
        gx_gates[t]
        + jnp.dot(s.astype(wdt), ws_ref[...], preferred_element_type=jnp.float32)
        + jnp.dot(a.astype(wdt), va_ref[...], preferred_element_type=jnp.float32)
    )
    r_t = gates[:, 0 * D:1 * D]
    p_t = gates[:, 1 * D:2 * D]
    z_t = gates[:, 2 * D:3 * D]

    h_tilde = jnp.tanh(
        gx_cand[t]
        + jnp.dot((r_t * s).astype(wdt), whh_ref[...], preferred_element_type=jnp.float32)
        + jnp.dot((p_t * a).astype(wdt), vhh_ref[...], preferred_element_type=jnp.float32)
    )

    new_s = (1.0 - z_t) * s + z_t * h_tilde
    s_state[...] = new_s
    out_ref[...] = new_s.astype(out_ref.dtype)   # HBM writeback happens once at grid end


def update_speaker_sequence(x_seq, spk0, adr_seq, packed):
    """Apply UpdateSpeaker T times recurrently; returns the final spk_vectors."""
    T, B, H = x_seq.shape
    D = spk0.shape[1]
    const2 = lambda shape: pl.BlockSpec(shape, lambda t: tuple(0 for _ in shape))

    return pl.pallas_call(
        update_speaker_seq_kernel,
        out_shape=jax.ShapeDtypeStruct((B, D), spk0.dtype),
        grid=(T,),
        in_specs=[
            pl.BlockSpec((T, B, H), lambda t: (0, 0, 0)),   # full x sequence (resident)
            pl.BlockSpec((1, B, D), lambda t: (t, 0, 0)),   # per-step adr_vectors
            const2((B, D)),                                 # initial speaker state
            const2((H, 3 * D)),                             # wx_g   (VMEM-resident)
            const2((H, D)),                                 # wx_h
            const2((D, 3 * D)),                             # ws_g
            const2((D, 3 * D)),                             # va_g
            const2((D, D)),                                 # whh
            const2((D, D)),                                 # vhh
        ],
        out_specs=const2((B, D)),
        scratch_shapes=[
            pltpu.VMEM((B, D), jnp.float32),          # recurrent state carry
            pltpu.VMEM((T, B, 3 * D), jnp.float32),   # hoisted x gate projection
            pltpu.VMEM((T, B, D), jnp.float32),       # hoisted x candidate projection
        ],
        compiler_params=pltpu.CompilerParams(
            dimension_semantics=("arbitrary",)),      # recurrence: serial over T
    )(x_seq, adr_seq, spk0,
      packed["wx_g"], packed["wx_h"], packed["ws_g"], packed["va_g"],
      packed["whh"], packed["vhh"])


# -----------------------------------------------------------------------------
# Pure-JAX reference matching the PyTorch forward exactly.
# -----------------------------------------------------------------------------
def reference_update_speaker(x, s, a, p):
    lin = lambda inp, w: inp @ w.T
    r_t = jax.nn.sigmoid(lin(x, p["WA_xr"]) + lin(s, p["WA_hr"]) + lin(a, p["VA_hr"]))
    p_t = jax.nn.sigmoid(lin(x, p["WA_xp"]) + lin(s, p["WA_hp"]) + lin(a, p["VA_hp"]))
    z_t = jax.nn.sigmoid(lin(x, p["WA_xz"]) + lin(s, p["WA_hz"]) + lin(a, p["VA_hz"]))
    h_tilde = jnp.tanh(lin(x, p["WA_xh"]) + lin(r_t * s, p["WA_hh"]) + lin(p_t * a, p["VA_hh"]))
    return (1.0 - z_t) * s + z_t * h_tilde


if __name__ == "__main__":
    # Small shapes consistent with the module:
    #   utter_hidden = 16 -> utter_hidden_size = 32, user_dim = 32, batch = 8, T = 6
    B, UTTER_HIDDEN, USER_DIM, T = 8, 16, 32, 6
    H = UTTER_HIDDEN * 2

    key = jax.random.PRNGKey(0)
    keys = jax.random.split(key, 18)

    def init_w(k, out_dim, in_dim):
        bound = 1.0 / jnp.sqrt(jnp.float32(in_dim))
        return jax.random.uniform(k, (out_dim, in_dim), jnp.float32, -bound, bound)

    params = {
        "WA_xr": init_w(keys[0], USER_DIM, H),
        "WA_xp": init_w(keys[1], USER_DIM, H),
        "WA_xz": init_w(keys[2], USER_DIM, H),
        "WA_xh": init_w(keys[3], USER_DIM, H),
        "WA_hr": init_w(keys[4], USER_DIM, USER_DIM),
        "WA_hp": init_w(keys[5], USER_DIM, USER_DIM),
        "WA_hz": init_w(keys[6], USER_DIM, USER_DIM),
        "WA_hh": init_w(keys[7], USER_DIM, USER_DIM),
        "VA_hr": init_w(keys[8], USER_DIM, USER_DIM),
        "VA_hp": init_w(keys[9], USER_DIM, USER_DIM),
        "VA_hz": init_w(keys[10], USER_DIM, USER_DIM),
        "VA_hh": init_w(keys[11], USER_DIM, USER_DIM),
    }

    encoder_hidden = jax.random.normal(keys[12], (B, H), jnp.float32)
    spk_vectors = jax.random.normal(keys[13], (B, USER_DIM), jnp.float32)
    adr_vectors = jax.random.normal(keys[14], (B, USER_DIM), jnp.float32)

    # One-time weight packing (hoisted out of the per-call path).
    # Use compute_dtype=jnp.bfloat16 for v6e/v7x MXU-native operands in prod;
    # f32 here keeps the 1e-5 exact reference check.
    packed = prepare_params(params, compute_dtype=jnp.float32)
    packed = jax.tree_util.tree_map(jax.block_until_ready, packed)

    # ---- single-step check (module forward) --------------------------------
    ref = reference_update_speaker(encoder_hidden, spk_vectors, adr_vectors, params)
    out = jax.block_until_ready(
        update_speaker(encoder_hidden, spk_vectors, adr_vectors, packed))
    assert out.shape == (B, USER_DIM)
    assert jnp.allclose(out, ref, atol=1e-5, rtol=1e-5), "single-step mismatch"

    # ---- fused T-step recurrence check (weights DMA'd once, state in VMEM) --
    x_seq = jax.random.normal(keys[15], (T, B, H), jnp.float32)
    adr_seq = jax.random.normal(keys[16], (T, B, USER_DIM), jnp.float32)
    spk0 = jax.random.normal(keys[17], (B, USER_DIM), jnp.float32)

    ref_s = spk0
    for t in range(T):
        ref_s = reference_update_speaker(x_seq[t], ref_s, adr_seq[t], params)

    out_seq = jax.block_until_ready(
        update_speaker_sequence(x_seq, spk0, adr_seq, packed))
    assert out_seq.shape == (B, USER_DIM)
    assert jnp.allclose(out_seq, ref_s, atol=1e-4, rtol=1e-4), "sequence mismatch"

    print("KERNEL_OK")
</pallas_src>

<mosaic_0001>
module attributes {stable_mosaic.version = 11 : i64} {
  func.func @update_speaker_kernel(%arg0: memref<8x32xf32, #tpu.memory_space<vmem>>, %arg1: memref<8x32xf32, #tpu.memory_space<vmem>>, %arg2: memref<8x32xf32, #tpu.memory_space<vmem>>, %arg3: memref<32x96xf32, #tpu.memory_space<vmem>>, %arg4: memref<32x32xf32, #tpu.memory_space<vmem>>, %arg5: memref<32x96xf32, #tpu.memory_space<vmem>>, %arg6: memref<32x96xf32, #tpu.memory_space<vmem>>, %arg7: memref<32x32xf32, #tpu.memory_space<vmem>>, %arg8: memref<32x32xf32, #tpu.memory_space<vmem>>, %arg9: memref<8x32xf32, #tpu.memory_space<vmem>>) attributes {dimension_semantics = [], scalar_prefetch = 0 : i64, scratch_operands = 0 : i64, tpu.core_type = #tpu.core_type<tc>} {
    %c0 = arith.constant 0 : index
    %c0_0 = arith.constant 0 : index
    %0 = vector.load %arg0[%c0, %c0_0] : memref<8x32xf32, #tpu.memory_space<vmem>>, vector<8x32xf32>
    %c0_1 = arith.constant 0 : index
    %c0_2 = arith.constant 0 : index
    %1 = vector.load %arg1[%c0_1, %c0_2] : memref<8x32xf32, #tpu.memory_space<vmem>>, vector<8x32xf32>
    %c0_3 = arith.constant 0 : index
    %c0_4 = arith.constant 0 : index
    %2 = vector.load %arg2[%c0_3, %c0_4] : memref<8x32xf32, #tpu.memory_space<vmem>>, vector<8x32xf32>
    %c0_5 = arith.constant 0 : index
    %c0_6 = arith.constant 0 : index
    %3 = vector.load %arg3[%c0_5, %c0_6] : memref<32x96xf32, #tpu.memory_space<vmem>>, vector<32x96xf32>
    %cst = arith.constant dense<0.000000e+00> : vector<8x96xf32>
    %4 = tpu.matmul %0, %3, %cst {dimension_numbers = #tpu.dot_dimension_numbers<[1], [0], [0], [1], [0, 0, 1, 1], [], []>} : vector<8x32xf32>, vector<32x96xf32>, vector<8x96xf32> -> vector<8x96xf32>
    %c0_7 = arith.constant 0 : index
    %c0_8 = arith.constant 0 : index
    %5 = vector.load %arg5[%c0_7, %c0_8] : memref<32x96xf32, #tpu.memory_space<vmem>>, vector<32x96xf32>
    %cst_9 = arith.constant dense<0.000000e+00> : vector<8x96xf32>
    %6 = tpu.matmul %1, %5, %cst_9 {dimension_numbers = #tpu.dot_dimension_numbers<[1], [0], [0], [1], [0, 0, 1, 1], [], []>} : vector<8x32xf32>, vector<32x96xf32>, vector<8x96xf32> -> vector<8x96xf32>
    %7 = arith.addf %4, %6 : vector<8x96xf32>
    %c0_10 = arith.constant 0 : index
    %c0_11 = arith.constant 0 : index
    %8 = vector.load %arg6[%c0_10, %c0_11] : memref<32x96xf32, #tpu.memory_space<vmem>>, vector<32x96xf32>
    %cst_12 = arith.constant dense<0.000000e+00> : vector<8x96xf32>
    %9 = tpu.matmul %2, %8, %cst_12 {dimension_numbers = #tpu.dot_dimension_numbers<[1], [0], [0], [1], [0, 0, 1, 1], [], []>} : vector<8x32xf32>, vector<32x96xf32>, vector<8x96xf32> -> vector<8x96xf32>
    %10 = arith.addf %7, %9 : vector<8x96xf32>
    %11 = arith.negf %10 : vector<8x96xf32>
    %12 = math.exp %11 : vector<8x96xf32>
    %cst_13 = arith.constant 1.000000e+00 : f32
    %13 = vector.broadcast %cst_13 : f32 to vector<8x96xf32>
    %14 = arith.addf %13, %12 : vector<8x96xf32>
    %15 = arith.divf %13, %14 : vector<8x96xf32>
    %16 = vector.extract_strided_slice %15 {offsets = [0, 0], sizes = [8, 32], strides = [1, 1]} : vector<8x96xf32> to vector<8x32xf32>
    %17 = vector.extract_strided_slice %15 {offsets = [0, 32], sizes = [8, 32], strides = [1, 1]} : vector<8x96xf32> to vector<8x32xf32>
    %18 = vector.extract_strided_slice %15 {offsets = [0, 64], sizes = [8, 32], strides = [1, 1]} : vector<8x96xf32> to vector<8x32xf32>
    %c0_14 = arith.constant 0 : index
    %c0_15 = arith.constant 0 : index
    %19 = vector.load %arg4[%c0_14, %c0_15] : memref<32x32xf32, #tpu.memory_space<vmem>>, vector<32x32xf32>
    %cst_16 = arith.constant dense<0.000000e+00> : vector<8x32xf32>
    %20 = tpu.matmul %0, %19, %cst_16 {dimension_numbers = #tpu.dot_dimension_numbers<[1], [0], [0], [1], [0, 0, 1, 1], [], []>} : vector<8x32xf32>, vector<32x32xf32>, vector<8x32xf32> -> vector<8x32xf32>
    %21 = arith.mulf %16, %1 : vector<8x32xf32>
    %c0_17 = arith.constant 0 : index
    %c0_18 = arith.constant 0 : index
    %22 = vector.load %arg7[%c0_17, %c0_18] : memref<32x32xf32, #tpu.memory_space<vmem>>, vector<32x32xf32>
    %cst_19 = arith.constant dense<0.000000e+00> : vector<8x32xf32>
    %23 = tpu.matmul %21, %22, %cst_19 {dimension_numbers = #tpu.dot_dimension_numbers<[1], [0], [0], [1], [0, 0, 1, 1], [], []>} : vector<8x32xf32>, vector<32x32xf32>, vector<8x32xf32> -> vector<8x32xf32>
    %24 = arith.addf %20, %23 : vector<8x32xf32>
    %25 = arith.mulf %17, %2 : vector<8x32xf32>
    %c0_20 = arith.constant 0 : index
    %c0_21 = arith.constant 0 : index
    %26 = vector.load %arg8[%c0_20, %c0_21] : memref<32x32xf32, #tpu.memory_space<vmem>>, vector<32x32xf32>
    %cst_22 = arith.constant dense<0.000000e+00> : vector<8x32xf32>
    %27 = tpu.matmul %25, %26, %cst_22 {dimension_numbers = #tpu.dot_dimension_numbers<[1], [0], [0], [1], [0, 0, 1, 1], [], []>} : vector<8x32xf32>, vector<32x32xf32>, vector<8x32xf32> -> vector<8x32xf32>
    %28 = arith.addf %24, %27 : vector<8x32xf32>
    %29 = math.tanh %28 : vector<8x32xf32>
    %cst_23 = arith.constant 1.000000e+00 : f32
    %30 = vector.broadcast %cst_23 : f32 to vector<8x32xf32>
    %31 = arith.subf %30, %18 : vector<8x32xf32>
    %32 = arith.mulf %31, %1 : vector<8x32xf32>
    %33 = arith.mulf %18, %29 : vector<8x32xf32>
    %34 = arith.addf %32, %33 : vector<8x32xf32>
    %c0_24 = arith.constant 0 : index
    %c0_25 = arith.constant 0 : index
    %35 = vector.load %arg9[%c0_24, %c0_25] : memref<8x32xf32, #tpu.memory_space<vmem>>, vector<8x32xf32>
    tpu.vector_store %arg9[%c0_24, %c0_25], %34 {strides = array<i32>} : memref<8x32xf32, #tpu.memory_space<vmem>>, vector<8x32xf32>,
    return
  }
}

</mosaic_0001>

<bundles_post_ra>
// kernel: tpu_custom_call.1
= control target key start
LH: loop header
LB: loop body
LE: loop exit
PB: predicated region body
PF: predicated region fallthrough
CT: control target
= control target key end

     0   :  { %14 = vsyncpa [#allocation3], 0  ;;  %s1327_s0 = inlined_call_operand.hbm [shape: f32[8,32], index: 0, kind: input, shape index: {}]   ;;  %s1328_s1 = inlined_call_operand.hbm [shape: f32[8,32], index: 1, kind: input, shape index: {}]   ;;  %s1329_s2 = inlined_call_operand.hbm [shape: f32[8,32], index: 2, kind: input, shape index: {}]   ;;  %s1330_s3 = inlined_call_operand.hbm [shape: f32[32,96], index: 3, kind: input, shape index: {}]   ;;  %s1331_s4 = inlined_call_operand.hbm [shape: f32[32,32], index: 4, kind: input, shape index: {}]   ;;  %s1332_s5 = inlined_call_operand.hbm [shape: f32[32,96], index: 5, kind: input, shape index: {}]   ;;  %s1333_s6 = inlined_call_operand.hbm [shape: f32[32,96], index: 6, kind: input, shape index: {}]   ;;  %s1334_s7 = inlined_call_operand.hbm [shape: f32[32,32], index: 7, kind: input, shape index: {}]   ;;  %s1335_s8 = inlined_call_operand.hbm [shape: f32[32,32], index: 8, kind: input, shape index: {}]   ;;  %s1336_s9 = inlined_call_operand.hbm [shape: f32[8,32], index: 9, kind: output, shape index: {}]  }
   0x1   :  { %15 = vsyncpa [#allocation6], 0 }
   0x2   :  { %16 = vsyncpa [#allocation9], 0 }
   0x3   :  { %17 = vsyncpa [#allocation12], 0 }
   0x4   :  { %18 = vsyncpa [#allocation15], 0 }
   0x5   :  { %19 = vsyncpa [#allocation4], 0  ;;  %s1066_s30 = smov [#allocation5]   ;;  %s1067_s11 = smov [#allocation8]  }
   0x6   :  { %s36_s10 = sshll.u32 %s1066_s30, 4  ;;  %s55_s12 = sshll.u32 %s1067_s11, 4  ;;  %s37_s10 = int_to_ptr.vmem [resolvable:$true] %s36_s10  ;;  %s1134_s12 = int_to_ptr.vmem [resolvable:$true] %s55_s12 }
   0x7   :  { %s834_s15 = scalar_lea.hbm %s1328_s1, 128 }
   0x8   :  { %p835_p0 = scmp.ne.s32.totalorder %s1328_s1, %s834_s15  ;;  %p838_p1 = scmp.lt.u32.totalorder %s834_s15, %s1328_s1 }
   0xa   :  { %p840_p2 = pnand %p838_p1, %p835_p0 }
   0xc   :  { %843 = shalt.err (!%p840_p2)
}
   0xd   :  { %s844_s20 = scalar_lea.vmem %s37_s10, 128  ;;  %p849_p4 = scmp.lt.s32.totalorder %s37_s10, %s37_s10 }
   0xe   :  { %p845_p3 = scmp.ne.s32.totalorder %s37_s10, %s844_s20  ;;  %p850_p5 = scmp.lt.s32.totalorder %s844_s20, %s844_s20 }
  0x10   :  { %p851_p6 = por %p850_p5, %p849_p4 }
  0x12   :  { %p852_p7 = pnand %p851_p6, %p845_p3 }
  0x14   :  { %855 = shalt.err (!%p852_p7)
}
  0x15   :  { %39 = dma.hbm_to_vmem [thread:$0]  %s1328_s1, 128, %s37_s10, [#allocation6]  }
  0x16   :  { %s856_s25 = scalar_lea.hbm %s1330_s3, 512 }
  0x17   :  { %p857_p8 = scmp.ne.s32.totalorder %s1330_s3, %s856_s25  ;;  %p860_p9 = scmp.lt.u32.totalorder %s856_s25, %s1330_s3 }
  0x19   :  { %p862_p10 = pnand %p860_p9, %p857_p8 }
  0x1b   :  { %865 = shalt.err (!%p862_p10)
}
  0x1c   :  { %s866_s30 = scalar_lea.vmem %s1134_s12, 512  ;;  %p871_p12 = scmp.lt.s32.totalorder %s1134_s12, %s1134_s12 }
  0x1d   :  { %p867_p11 = scmp.ne.s32.totalorder %s1134_s12, %s866_s30  ;;  %p872_p13 = scmp.lt.s32.totalorder %s866_s30, %s866_s30 }
  0x1f   :  { %p873_p0 = por %p872_p13, %p871_p12 }
  0x21   :  { %p874_p1 = pnand %p873_p0, %p867_p11 }
  0x23   :  { %877 = shalt.err (!%p874_p1)
}
  0x24   :  { %s1068_s1 = smov 128   ;;  %s1069_s10 = smov 8  }
  0x25   :  { %61 = dma.hbm_to_vmem [thread:$0]  %s1330_s3, 512, %s1134_s12, [#allocation9], %s1068_s1, %s1068_s1, %s1069_s10  }
  0x26   :  { %s1070_s14 = smov [#allocation11]   ;;  %s1071_s16 = smov [#allocation14]  }
  0x27   :  { %s79_s15 = sshll.u32 %s1070_s14, 4  ;;  %s103_s17 = sshll.u32 %s1071_s16, 4  ;;  %s80_s15 = int_to_ptr.vmem [resolvable:$true] %s79_s15  ;;  %s1168_s17 = int_to_ptr.vmem [resolvable:$true] %s103_s17 }
  0x28   :  { %s878_s20 = scalar_lea.hbm %s1332_s5, 512 }
  0x29   :  { %p879_p2 = scmp.ne.s32.totalorder %s1332_s5, %s878_s20  ;;  %p882_p3 = scmp.lt.u32.totalorder %s878_s20, %s1332_s5 }
  0x2b   :  { %p884_p4 = pnand %p882_p3, %p879_p2 }
  0x2d   :  { %887 = shalt.err (!%p884_p4)
}
  0x2e   :  { %s888_s3 = scalar_lea.vmem %s80_s15, 512  ;;  %p893_p6 = scmp.lt.s32.totalorder %s80_s15, %s80_s15 }
  0x2f   :  { %p889_p5 = scmp.ne.s32.totalorder %s80_s15, %s888_s3  ;;  %p894_p7 = scmp.lt.s32.totalorder %s888_s3, %s888_s3 }
  0x31   :  { %p895_p8 = por %p894_p7, %p893_p6 }
  0x33   :  { %p896_p9 = pnand %p895_p8, %p889_p5 }
  0x35   :  { %899 = shalt.err (!%p896_p9)
}
  0x36   :  { %85 = dma.hbm_to_vmem [thread:$0]  %s1332_s5, 512, %s80_s15, [#allocation12], %s1068_s1, %s1068_s1, %s1069_s10  }
  0x37   :  { %s900_s28 = scalar_lea.hbm %s1334_s7, 512 }
  0x38   :  { %p901_p10 = scmp.ne.s32.totalorder %s1334_s7, %s900_s28  ;;  %p904_p11 = scmp.lt.u32.totalorder %s900_s28, %s1334_s7 }
  0x3a   :  { %p906_p12 = pnand %p904_p11, %p901_p10 }
  0x3c   :  { %909 = shalt.err (!%p906_p12)
}
  0x3d   :  { %s910_s14 = scalar_lea.vmem %s1168_s17, 512  ;;  %p915_p0 = scmp.lt.s32.totalorder %s1168_s17, %s1168_s17 }
  0x3e   :  { %p911_p13 = scmp.ne.s32.totalorder %s1168_s17, %s910_s14  ;;  %p916_p1 = scmp.lt.s32.totalorder %s910_s14, %s910_s14 }
  0x40   :  { %p917_p2 = por %p916_p1, %p915_p0 }
  0x42   :  { %p918_p3 = pnand %p917_p2, %p911_p13 }
  0x44   :  { %921 = shalt.err (!%p918_p3)
}
  0x45   :  { %109 = dma.hbm_to_vmem [thread:$0]  %s1334_s7, 512, %s1168_s17, [#allocation15], %s1068_s1, %s1068_s1, %s1069_s10  }
  0x46   :  { %s1072_s16 = smov [#allocation2]   ;;  %s1073_s19 = smov [#allocation7]  }
  0x47   :  { %s26_s18 = sshll.u32 %s1072_s16, 4  ;;  %s46_s20 = sshll.u32 %s1073_s19, 4  ;;  %s27_s18 = int_to_ptr.vmem [resolvable:$true] %s26_s18  ;;  %s47_s20 = int_to_ptr.vmem [resolvable:$true] %s46_s20 }
  0x48   :  { %s922_s23 = scalar_lea.hbm %s1327_s0, 128 }
  0x49   :  { %p923_p4 = scmp.ne.s32.totalorder %s1327_s0, %s922_s23  ;;  %p926_p5 = scmp.lt.u32.totalorder %s922_s23, %s1327_s0 }
  0x4b   :  { %p928_p6 = pnand %p926_p5, %p923_p4 }
  0x4d   :  { %931 = shalt.err (!%p928_p6)
}
  0x4e   :  { %s932_s7 = scalar_lea.vmem %s27_s18, 128  ;;  %p937_p8 = scmp.lt.s32.totalorder %s27_s18, %s27_s18 }
  0x4f   :  { %p933_p7 = scmp.ne.s32.totalorder %s27_s18, %s932_s7  ;;  %p938_p9 = scmp.lt.s32.totalorder %s932_s7, %s932_s7 }
  0x51   :  { %p939_p10 = por %p938_p9, %p937_p8 }
  0x53   :  { %p940_p11 = pnand %p939_p10, %p933_p7 }
  0x55   :  { %943 = shalt.err (!%p940_p11)
}
  0x56   :  { %29 = dma.hbm_to_vmem [thread:$0]  %s1327_s0, 128, %s27_s18, [#allocation3]  }
  0x57   :  { %s944_s29 = scalar_lea.hbm %s1329_s2, 128 }
  0x58   :  { %p945_p12 = scmp.ne.s32.totalorder %s1329_s2, %s944_s29  ;;  %p948_p13 = scmp.lt.u32.totalorder %s944_s29, %s1329_s2 }
  0x5a   :  { %p950_p0 = pnand %p948_p13, %p945_p12 }
  0x5c   :  { %953 = shalt.err (!%p950_p0)
}
  0x5d   :  { %s954_s5 = scalar_lea.vmem %s47_s20, 128  ;;  %p959_p2 = scmp.lt.s32.totalorder %s47_s20, %s47_s20 }
  0x5e   :  { %p955_p1 = scmp.ne.s32.totalorder %s47_s20, %s954_s5  ;;  %p960_p3 = scmp.lt.s32.totalorder %s954_s5, %s954_s5 }
  0x60   :  { %p961_p4 = por %p960_p3, %p959_p2 }
  0x62   :  { %p962_p5 = pnand %p961_p4, %p955_p1 }
  0x64   :  { %965 = shalt.err (!%p962_p5)
}
  0x65   :  { %49 = dma.hbm_to_vmem [thread:$0]  %s1329_s2, 128, %s47_s20, [#allocation6]  }
  0x66   :  { %s1074_s16 = smov [#allocation10]   ;;  %s1075_s19 = smov [#allocation13]  }
  0x67   :  { %s67_s18 = sshll.u32 %s1074_s16, 4  ;;  %s91_s21 = sshll.u32 %s1075_s19, 4  ;;  %s68_s18 = int_to_ptr.vmem [resolvable:$true] %s67_s18  ;;  %s1229_s21 = int_to_ptr.vmem [resolvable:$true] %s91_s21 }
  0x68   :  { %s966_s24 = scalar_lea.hbm %s1331_s4, 512 }
  0x69   :  { %p967_p6 = scmp.ne.s32.totalorder %s1331_s4, %s966_s24  ;;  %p970_p7 = scmp.lt.u32.totalorder %s966_s24, %s1331_s4 }
  0x6b   :  { %p972_p8 = pnand %p970_p7, %p967_p6 }
  0x6d   :  { %975 = shalt.err (!%p972_p8)
}
  0x6e   :  { %s976_s2 = scalar_lea.vmem %s68_s18, 512  ;;  %p981_p10 = scmp.lt.s32.totalorder %s68_s18, %s68_s18 }
  0x6f   :  { %p977_p9 = scmp.ne.s32.totalorder %s68_s18, %s976_s2  ;;  %p982_p11 = scmp.lt.s32.totalorder %s976_s2, %s976_s2 }
  0x71   :  { %p983_p12 = por %p982_p11, %p981_p10 }
  0x73   :  { %p984_p13 = pnand %p983_p12, %p977_p9 }
  0x75   :  { %987 = shalt.err (!%p984_p13)
}
  0x76   :  { %73 = dma.hbm_to_vmem [thread:$0]  %s1331_s4, 512, %s68_s18, [#allocation9], %s1068_s1, %s1068_s1, %s1069_s10  }
  0x77   :  { %s988_s28 = scalar_lea.hbm %s1333_s6, 512 }
  0x78   :  { %p989_p0 = scmp.ne.s32.totalorder %s1333_s6, %s988_s28  ;;  %p992_p1 = scmp.lt.u32.totalorder %s988_s28, %s1333_s6 }
  0x7a   :  { %p994_p2 = pnand %p992_p1, %p989_p0 }
  0x7c   :  { %997 = shalt.err (!%p994_p2)
}
  0x7d   :  { %s998_s14 = scalar_lea.vmem %s1229_s21, 512  ;;  %p1003_p4 = scmp.lt.s32.totalorder %s1229_s21, %s1229_s21 }
  0x7e   :  { %p999_p3 = scmp.ne.s32.totalorder %s1229_s21, %s998_s14  ;;  %p1004_p5 = scmp.lt.s32.totalorder %s998_s14, %s998_s14 }
  0x80   :  { %p1005_p6 = por %p1004_p5, %p1003_p4 }
  0x82   :  { %p1006_p7 = pnand %p1005_p6, %p999_p3 }
  0x84   :  { %1009 = shalt.err (!%p1006_p7)
}
  0x85   :  { %97 = dma.hbm_to_vmem [thread:$0]  %s1333_s6, 512, %s1229_s21, [#allocation12], %s1068_s1, %s1068_s1, %s1069_s10  }
  0x86   :  { %s1076_s0 = smov [#allocation16]   ;;  %s1010_s19 = scalar_lea.hbm %s1335_s8, 512 }
  0x87   :  { %s115_s15 = sshll.u32 %s1076_s0, 4  ;;  %p1011_p8 = scmp.ne.s32.totalorder %s1335_s8, %s1010_s19  ;;  %s116_s15 = int_to_ptr.vmem [resolvable:$true] %s115_s15 }
  0x88   :  { %p1014_p9 = scmp.lt.u32.totalorder %s1010_s19, %s1335_s8 }
  0x8a   :  { %p1016_p10 = pnand %p1014_p9, %p1011_p8 }
  0x8c   :  { %1019 = shalt.err (!%p1016_p10)
}
  0x8d   :  { %s1020_s12 = scalar_lea.vmem %s116_s15, 512  ;;  %p1025_p12 = scmp.lt.s32.totalorder %s116_s15, %s116_s15 }
  0x8e   :  { %p1021_p11 = scmp.ne.s32.totalorder %s116_s15, %s1020_s12  ;;  %p1026_p13 = scmp.lt.s32.totalorder %s1020_s12, %s1020_s12 }
  0x90   :  { %p1027_p0 = por %p1026_p13, %p1025_p12 }
  0x92   :  { %p1028_p1 = pnand %p1027_p0, %p1021_p11 }
  0x94   :  { %1031 = shalt.err (!%p1028_p1)
}
  0x95   :  { %121 = dma.hbm_to_vmem [thread:$0]  %s1335_s8, 512, %s116_s15, [#allocation15], %s1068_s1, %s1068_s1, %s1069_s10  }
  0x96   :  { %1054 = dma.done.wait [#allocation3], 128  }
  0x97   :  { %1055 = vsyncadd [#allocation3], 4294967168 }
  0x98   :  { %1056 = dma.done.wait [#allocation6], 256  }
  0x99   :  { %1057 = vsyncadd [#allocation6], 4294967040 }
  0x9a   :  { %1058 = dma.done.wait [#allocation9], 1024  }
  0x9b   :  { %1059 = vsyncadd [#allocation9], 4294966272 }
  0x9c   :  { %1060 = dma.done.wait [#allocation12], 1024  }
  0x9d   :  { %1061 = vsyncadd [#allocation12], 4294966272 }
  0x9e   :  { %1062 = dma.done.wait [#allocation15], 1024  }
  0x9f   :  { %1063 = vsyncadd [#allocation15], 4294966272  ;;  %v1077_v0 = vmov 0.0|0.0   ;;  %vm1078_vm0 = vmmov 0   ;;  %v1079_v1 = vmov 0.0   ;;  %v156_v2 = vld [vmem:[#allocation11] sm:$0xff] }
  0xa0   :  { %766 = vmatprep.subr.bf16.mxu0 %v1077_v0  ;;  %708 = vmatprep.mubr.msk.f32.mxu0 %vm1078_vm0, %v1079_v1  ;;  %v157_v3 = vld [vmem:[#allocation11 + $0x8] sm:$0xff]  ;;  %v158_v4 = vld [vmem:[#allocation11 + $0x10] sm:$0xff]  ;;  %v159_v6 = vld [vmem:[#allocation11 + $0x18] sm:$0xff]  ;;  %s1080_s8 = smov 64   ;;  %s1081_s1 = smov 32   ;;  %vm160_vm1 = vcmask 261120  }
  0xa1   :  { %784 = vmatprep.subr.bf16.mxu1 %v1077_v0  ;;  %741 = vmatprep.mubr.msk.f32.mxu1 %vm1078_vm0, %v1079_v1  ;;  %v767_v5 = vpack.c.bf16 %v157_v3, %v156_v2  ;;  %v150_v7 = vld [vmem:[#allocation5] sm:$0xff]  ;;  %v770_v8 = vpack.c.bf16 %v159_v6, %v158_v4  ;;  %v152_v9 = vld [vmem:[#allocation8] sm:$0xff]  ;;  %v153_v10 = vld [vmem:[#allocation8 + $0x8] sm:$0xff]  ;;  %s1082_s10 = smov 96   ;;  %s1083_s25 = smov [#allocation17]  }
  0xa2   :  { %629 = vrot.lane.b32.xlu1 %v150_v7, %s1080_s8  ;;  %v151_v11 = vld [vmem:[#allocation7] sm:$0xff]  ;;  %v773_v12 = vpack.c.bf16 %v153_v10, %v152_v9  ;;  %v154_v13 = vld [vmem:[#allocation8 + $0x10] sm:$0xff]  ;;  %v307_v16 = vld [vmem:[#allocation13] sm:$0xff]  ;;  %s650_s7 = sshll.u32 %s1083_s25, 4  ;;  %s651_s7 = int_to_ptr.vmem [resolvable:$true] %s650_s7 }
  0xa3   :  { %768 = vmatpush3.bf16.msra.mxu0 %v767_v5  ;;  %543 = vrot.lane.b32.xlu0 %v151_v11, %s1081_s1  ;;  %v155_v14 = vld [vmem:[#allocation8 + $0x18] sm:$0xff]  ;;  %v308_v17 = vld [vmem:[#allocation13 + $0x8] sm:$0xff]  ;;  %v309_v20 = vld [vmem:[#allocation13 + $0x10] sm:$0xff]  ;;  %s1032_s2 = scalar_lea.vmem %s651_s7, 128  ;;  %p1037_p3 = scmp.lt.s32.totalorder %s651_s7, %s651_s7 }
  0xa4   :  { %769 = vmatprep.subr.bf16.mxu0 %v1077_v0  ;;  %v776_v15 = vpack.c.bf16 %v155_v14, %v154_v13  ;;  %v149_v18 = vld [vmem:[#allocation2] sm:$0xff]  ;;  %v779_v19 = vpack.c.bf16 %v308_v17, %v307_v16  ;;  %v310_v21 = vld [vmem:[#allocation13 + $0x18] sm:$0xff]  ;;  %v396_v23 = vld [vmem:[#allocation14] sm:$0xff]  ;;  %p1033_p2 = scmp.ne.s32.totalorder %s651_s7, %s1032_s2  ;;  %p1038_p4 = scmp.lt.s32.totalorder %s1032_s2, %s1032_s2 }
  0xa5   :  { %v782_v22 = vpack.c.bf16 %v310_v21, %v309_v20  ;;  %v397_v24 = vld [vmem:[#allocation14 + $0x8] sm:$0xff]  ;;  %v398_v25 = vld [vmem:[#allocation14 + $0x10] sm:$0xff]  ;;  %v399_v27 = vld [vmem:[#allocation14 + $0x18] sm:$0xff] }
  0xa6   :  { %v785_v26 = vpack.c.bf16 %v397_v24, %v396_v23  ;;  %v788_v28 = vpack.c.bf16 %v399_v27, %v398_v25  ;;  %v391_v34 = vld [vmem:[#allocation10] sm:$0xff]  ;;  %v392_v35 = vld [vmem:[#allocation10 + $0x8] sm:$0xff]  ;;  %v393_v41 = vld [vmem:[#allocation10 + $0x10] sm:$0xff]  ;;  %p1039_p5 = por %p1038_p4, %p1037_p3 }
  0xa7   :  { %771 = vmatpush3.bf16.msra.mxu0 %v770_v8  ;;  %v791_v38 = vpack.c.bf16 %v392_v35, %v391_v34  ;;  %v394_v42 = vld [vmem:[#allocation10 + $0x18] sm:$0xff]  ;;  %v547_v44 = vld [vmem:[#allocation16] sm:$0xff]  ;;  %v548_v45 = vld [vmem:[#allocation16 + $0x8] sm:$0xff] }
  0xa8   :  { %772 = vmatprep.subr.bf16.mxu0 %v1077_v0  ;;  %786 = vmatpush3.bf16.msra.mxu1 %v785_v26  ;;  %v794_v43 = vpack.c.bf16 %v394_v42, %v393_v41  ;;  %v797_v46 = vpack.c.bf16 %v548_v45, %v547_v44  ;;  %v549_v47 = vld [vmem:[#allocation16 + $0x10] sm:$0xff]  ;;  %v550_v48 = vld [vmem:[#allocation16 + $0x18] sm:$0xff]  ;;  %p1040_p6 = pnand %p1039_p5, %p1033_p2 }
  0xa9   :  { %787 = vmatprep.subr.bf16.mxu1 %v1077_v0  ;;  %v800_v49 = vpack.c.bf16 %v550_v48, %v549_v47 }
  0xaa   :  { %709 = vmatmul.mubr.msk.f32.vlgmr.msra.gmra.mrb[0].mxu0 %vm160_vm1, %v150_v7 }
  0xab   :  { %774 = vmatpush3.bf16.msra.mxu0 %v773_v12  ;;  %719 = vmatprep.mubr.msk.f32.mxu0 %vm1078_vm0, %v1079_v1 }
  0xac   :  { %775 = vmatprep.subr.bf16.mxu0 %v1077_v0  ;;  %789 = vmatpush3.bf16.msra.mxu1 %v788_v28 }
  0xad   :  { %790 = vmatprep.subr.bf16.mxu1 %v1077_v0 }
  0xaf   :  { %777 = vmatpush3.bf16.msra.mxu0 %v776_v15 }
  0xb0   :  { %778 = vmatprep.subr.bf16.mxu0 %v1077_v0 }
  0xb2   :  { %720 = vmatmul.mubr.msk.f32.vlgmr.msra.gmra.mrb[0].mxu0 %vm160_vm1, %v149_v18 }
  0xb3   :  { %780 = vmatpush3.bf16.msra.mxu0 %v779_v19  ;;  %730 = vmatprep.mubr.msk.f32.mxu0 %vm1078_vm0, %v1079_v1 }
  0xb4   :  { %781 = vmatprep.subr.bf16.mxu0 %v1077_v0 }
  0xb7   :  { %783 = vmatpush3.bf16.msra.mxu0 %v782_v22 }
  0xba   :  { %731 = vmatmul.mubr.msk.f32.vlgmr.msra.gmra.mrb[0].mxu0 %vm160_vm1, %v151_v11 }
 0x114   :  { %v630_v54 = vpop.permute.xlu1 %629 }
 0x115   :  { %v544_v36 = vpop.permute.xlu0 %543 }
 0x18d   :  { %v380_v29 = vpop.f32.mrb[0].mxu0 }
 0x18e   :  { %v666_v30 = vmul.f32 -1.442695, %v380_v29  ;;  %v732_v31 = vpop.f32.mrb[1].mxu0 }
 0x190   :  { %828 = vpow2.f32 %v666_v30 }
 0x19a   :  { %v829_v32 = vpop.eup %828 }
 0x19b   :  { %v388_v33 = vadd.f32 1.0, %v829_v32 }
 0x19d   :  { %830 = vrcp.f32 %v388_v33 }
 0x1a7   :  { %v831_v37 = vpop.eup %830 }
 0x1a8   :  { %v546_v39 = vmul.f32 %v831_v37, %v544_v36  ;;  %v395_v40 = vmul.f32 %v831_v37, %v150_v7  ;;  %v628_v55 = vsub.f32 1.0, %v831_v37 }
 0x1aa   :  { %552 = vrot.lane.b32.xlu0 %v546_v39, %s1082_s10  ;;  %742 = vmatmul.mubr.msk.f32.vlgmr.msra.gmra.mrb[0].mxu1 %vm160_vm1, %v395_v40  ;;  %v632_v57 = vmul.f32 %v630_v54, %v628_v55 }
 0x1ab   :  { %792 = vmatpush3.bf16.msra.mxu1 %v791_v38  ;;  %752 = vmatprep.mubr.msk.f32.mxu1 %vm1078_vm0, %v1079_v1 }
 0x1ac   :  { %793 = vmatprep.subr.bf16.mxu1 %v1077_v0 }
 0x1af   :  { %795 = vmatpush3.bf16.msra.mxu1 %v794_v43 }
 0x1b0   :  { %796 = vmatprep.subr.bf16.mxu1 %v1077_v0 }
 0x1b2   :  { %753 = vmatmul.mubr.msk.f32.vlgmr.msra.gmra.mrb[0].mxu1 %vm160_vm1, %v149_v18 }
 0x1b3   :  { %798 = vmatpush3.bf16.msra.mxu1 %v797_v46  ;;  %763 = vmatprep.mubr.msk.f32.mxu1 %vm1078_vm0, %v1079_v1 }
 0x1b4   :  { %799 = vmatprep.subr.bf16.mxu1 %v1077_v0 }
 0x1b7   :  { %801 = vmatpush3.bf16.msra.mxu1 %v800_v49 }
 0x21c   :  { %v553_v50 = vpop.permute.xlu0 %552 }
 0x21d   :  { %764 = vmatmul.mubr.msk.f32.vlgmr.msra.gmra.mrb[0].mxu1 %vm160_vm1, %v553_v50 }
 0x2f0   :  { %v622_v51 = vpop.f32.mrb[0].mxu1 }
 0x2f1   :  { %832 = vtanh.f32 %v622_v51  ;;  %v765_v52 = vpop.f32.mrb[1].mxu1 }
 0x2fb   :  { %v833_v53 = vpop.eup %832 }
 0x2fc   :  { %634 = vrot.lane.b32.xlu1 %v833_v53, %s1080_s8 }
 0x36e   :  { %v635_v56 = vpop.permute.xlu1 %634 }
 0x36f   :  { %v637_v58 = vmul.f32 %v831_v37, %v635_v56 }
 0x371   :  { %v638_v59 = vadd.f32 %v637_v58, %v632_v57 }
 0x373   :  { %640 = vrot.lane.b32.xlu0 %v638_v59, %s1080_s8 }
 0x3e5   :  { %v641_v60 = vpop.permute.xlu0 %640 }
 0x3e6   :  { %643 = vst.msk [vmem:[#allocation17] sm:$0xff] %vm160_vm1, %v641_v60 }
 0x3e7   :  { %1043 = shalt.err (!%p1040_p6)
}
 0x3e8   :  { %s1044_s26 = scalar_lea.hbm %s1336_s9, 128 }
 0x3e9   :  { %p1045_p7 = scmp.ne.s32.totalorder %s1336_s9, %s1044_s26  ;;  %p1048_p8 = scmp.lt.u32.totalorder %s1044_s26, %s1336_s9 }
 0x3eb   :  { %p1050_p9 = pnand %p1048_p8, %p1045_p7 }
 0x3ed   :  { %1053 = shalt.err (!%p1050_p9)
}
 0x3ee   :  { %653 = dma.vmem_to_hbm [thread:$0]  %s651_s7, 128, %s1336_s9, [#allocation4]  }
 0x3ef   :  { %1064 = dma.done.wait [#allocation4], 128  }
 0x3f0   :  { %1065 = vsyncadd [#allocation4], 4294967168 }
 0x3f1   :  { %657 = vsyncpa [#allocation3], 1 }
 0x3f2   :  { %658 = vsyncpa [#allocation6], 1 }
 0x3f3   :  { %659 = vsyncpa [#allocation9], 1 }
 0x3f4   :  { %660 = vsyncpa [#allocation12], 1 }
 0x3f5   :  { %661 = vsyncpa [#allocation15], 1 }
 0x3f6   :  { %662 = vsyncpa [#allocation4], 1 }

</bundles_post_ra>
